<compile_context>
chip_gen: v6e
topology: v6e:2x2x1
jax: 0.10.0
libtpu: 0.0.40
codegen_flags: <defaults>
</compile_context>

<pallas_src>
import functools

import jax
import jax.numpy as jnp
from jax.experimental import pallas as pl
from jax.experimental.pallas import tpu as pltpu


def _angle_resnet_kernel(
    ss_ref,                      # [rt, 2*c_in]  lane-packed [s | s_initial]
    w_io_ref, b_io_ref,          # fused linear_in/linear_initial: [2*c_in, c_h], [1, c_h]
    w1_ref, b1_ref, w2_ref, b2_ref,   # resnet blocks: [B, c_h, c_h], [B, 1, c_h]
    w_out_ref, b_out_ref,        # fused linear_out (cols = [x... | y...]): [c_h, 2A], [1, 2A]
    o_ref,                       # [rt, 4*no_angles] = [ux | uy | nx | ny]
    *, no_blocks: int, no_angles: int, eps: float,
):
    f32 = jnp.float32
    cdt = w_io_ref.dtype  # MXU input dtype (bf16 fast path, or f32)

    # s = linear_in(relu(s)) + linear_initial(relu(s_initial)), as ONE matmul:
    # relu([s | s_i]) @ [[w_in],[w_init]] + (b_in + b_init)
    a = jnp.maximum(ss_ref[...], 0.0).astype(cdt)
    x = jnp.dot(a, w_io_ref[...], preferred_element_type=f32) + b_io_ref[...]

    # resnet blocks (unrolled; no_blocks is static), f32 residual stream
    for b in range(no_blocks):
        h = jnp.maximum(x, 0.0).astype(cdt)
        h = jnp.dot(h, w1_ref[b], preferred_element_type=f32) + b1_ref[b]
        h = jnp.maximum(h, 0.0).astype(cdt)
        h = jnp.dot(h, w2_ref[b], preferred_element_type=f32) + b2_ref[b]
        x = x + h

    # Fused output projection; columns pre-arranged as [x-angles | y-angles].
    xo = jnp.maximum(x, 0.0).astype(cdt)
    o = jnp.dot(xo, w_out_ref[...], preferred_element_type=f32) + b_out_ref[...]
    ox = o[:, :no_angles]
    oy = o[:, no_angles:]

    # per-angle normalization: v / sqrt(clamp(x^2 + y^2, min=eps)), via rsqrt (EUP)
    inv = jax.lax.rsqrt(jnp.maximum(ox * ox + oy * oy, eps))

    # Single lane-concatenated output block: [ux | uy | nx | ny]
    o_ref[...] = jnp.concatenate([o, ox * inv, oy * inv], axis=-1)


def _round_up(x: int, m: int) -> int:
    return -(-x // m) * m


def _choose_row_tile(n: int, row_tile_max: int = 512, min_grid: int = 4) -> int:
    """Multiple-of-8 row tile, capped at row_tile_max, preferring >= min_grid grid steps."""
    rt = max(8, _round_up(-(-n // min_grid), 8))
    return min(row_tile_max, rt)


def angle_resnet_forward(s, s_initial, params, *, no_blocks, no_angles, eps,
                         row_tile=512, compute_dtype=jnp.bfloat16):
    """s, s_initial: [..., c_in].  Returns (unnormalized [..., A, 2], normalized [..., A, 2])."""
    batch_shape = s.shape[:-1]
    c_in = s.shape[-1]
    c_hidden = params["w_in"].shape[-1]
    A = no_angles
    f32 = jnp.float32
    cdt = compute_dtype

    # Lane-pack the two inputs so linear_in / linear_initial fuse into one matmul.
    ss = jnp.concatenate(
        [s.reshape(-1, c_in).astype(f32), s_initial.reshape(-1, c_in).astype(f32)],
        axis=-1)
    n = ss.shape[0]

    # Pick a row tile and pad the flattened batch up to a multiple of it.
    rt = _choose_row_tile(n, row_tile_max=row_tile)
    n_pad = _round_up(n, rt)
    if n_pad != n:
        ss = jnp.pad(ss, ((0, n_pad - n), (0, 0)))
    ss = ss.astype(cdt)

    # Fused input projection; biases stay f32 (added to the f32 accumulator).
    w_io = jnp.concatenate([params["w_in"], params["w_init"]], axis=0).astype(cdt)
    b_io = (params["b_in"] + params["b_init"]).astype(f32)

    w1 = params["w1"].astype(cdt); b1 = params["b1"].astype(f32)
    w2 = params["w2"].astype(cdt); b2 = params["b2"].astype(f32)

    # Fuse linear_out into one lane-dense projection with columns [x... | y...].
    w_out = params["w_out"].astype(f32)    # (c_hidden, 2*A), interleaved x,y,x,y,...
    b_out = params["b_out"].astype(f32)    # (1, 2*A)
    w_out_f = jnp.concatenate([w_out[:, 0::2], w_out[:, 1::2]], axis=-1).astype(cdt)
    b_out_f = jnp.concatenate([b_out[:, 0::2], b_out[:, 1::2]], axis=-1)

    kernel = functools.partial(
        _angle_resnet_kernel, no_blocks=no_blocks, no_angles=A, eps=eps)

    full = lambda shape: pl.BlockSpec(shape, lambda i: (0,) * len(shape))
    row = lambda c: pl.BlockSpec((rt, c), lambda i: (i, 0))

    grid = (n_pad // rt,)
    out_sds = jax.ShapeDtypeStruct((n_pad, 4 * A), f32)

    out = pl.pallas_call(
        kernel,
        out_shape=out_sds,
        grid_spec=pltpu.PrefetchScalarGridSpec(
            num_scalar_prefetch=0,
            grid=grid,
            in_specs=[
                row(2 * c_in),                                        # [s | s_initial]
                full((2 * c_in, c_hidden)), full((1, c_hidden)),      # fused in/initial
                full((no_blocks, c_hidden, c_hidden)),                # block linear_1 W
                full((no_blocks, 1, c_hidden)),                       # block linear_1 b
                full((no_blocks, c_hidden, c_hidden)),                # block linear_2 W
                full((no_blocks, 1, c_hidden)),                       # block linear_2 b
                full((c_hidden, 2 * A)), full((1, 2 * A)),            # fused linear_out
            ],
            out_specs=row(4 * A),                                     # [ux|uy|nx|ny]
        ),
        compiler_params=pltpu.CompilerParams(
            dimension_semantics=("parallel",),
            vmem_limit_bytes=32 * 1024 * 1024,
        ),
    )(ss, w_io, b_io, w1, b1, w2, b2, w_out_f, b_out_f)

    out = out[:n]
    ux, uy = out[:, :A], out[:, A:2 * A]
    nx, ny = out[:, 2 * A:3 * A], out[:, 3 * A:]

    # Re-interleave x/y into the trailing pair dim: [..., no_angles, 2].
    unnormalized = jnp.stack([ux, uy], axis=-1).reshape(batch_shape + (A, 2))
    normalized = jnp.stack([nx, ny], axis=-1).reshape(batch_shape + (A, 2))
    return unnormalized, normalized


def _reference_forward(s, s_initial, params, *, no_blocks, no_angles, eps,
                       compute_dtype=jnp.float32):
    """Pure-JAX reference mirroring the PyTorch module (and the kernel's cast points)."""
    f32 = jnp.float32
    cdt = compute_dtype
    relu = lambda x: jnp.maximum(x, 0.0)
    dot = lambda x, w: jnp.dot(x.astype(cdt), w.astype(cdt), preferred_element_type=f32)

    s = s.astype(f32)
    s_initial = s_initial.astype(f32)
    si = dot(relu(s_initial), params["w_init"]) + params["b_init"][0]
    x = dot(relu(s), params["w_in"]) + params["b_in"][0]
    x = x + si
    for b in range(no_blocks):
        a = dot(relu(x), params["w1"][b]) + params["b1"][b, 0]
        a = dot(relu(a), params["w2"][b]) + params["b2"][b, 0]
        x = x + a
    x = dot(relu(x), params["w_out"]) + params["b_out"][0]
    x = x.reshape(x.shape[:-1] + (no_angles, 2))
    un = x
    denom = jnp.sqrt(jnp.clip(jnp.sum(x * x, axis=-1, keepdims=True), eps, None))
    return un, x / denom


def make_params(key, c_in, c_hidden, no_blocks, no_angles):
    """Deterministic synthetic parameters (shapes match the nn.Module __init__)."""
    ks = jax.random.split(key, 10)
    normal = lambda k, shape, scale: (scale * jax.random.normal(k, shape)).astype(jnp.float32)
    return {
        "w_init": normal(ks[0], (c_in, c_hidden), 0.1),
        "b_init": normal(ks[1], (1, c_hidden), 0.05),
        "w_in": normal(ks[2], (c_in, c_hidden), 0.1),
        "b_in": normal(ks[3], (1, c_hidden), 0.05),
        "w1": normal(ks[4], (no_blocks, c_hidden, c_hidden), 0.1),
        "b1": normal(ks[5], (no_blocks, 1, c_hidden), 0.05),
        "w2": normal(ks[6], (no_blocks, c_hidden, c_hidden), 0.1),
        "b2": normal(ks[7], (no_blocks, 1, c_hidden), 0.05),
        "w_out": normal(ks[8], (c_hidden, no_angles * 2), 0.1),
        "b_out": normal(ks[9], (1, no_angles * 2), 0.05),
    }


if __name__ == "__main__":
    # Small shapes consistent with the module: [*, c_in] single embeddings.
    C_IN, C_HIDDEN = 48, 32
    NO_BLOCKS, NO_ANGLES, EPS = 2, 7, 1e-12
    BATCH, SEQ = 2, 8   # leading batch dims; flattened N = 16 rows

    key = jax.random.PRNGKey(0)
    k_s, k_si, k_p = jax.random.split(key, 3)
    s = jax.random.normal(k_s, (BATCH, SEQ, C_IN), dtype=jnp.float32)
    s_initial = jax.random.normal(k_si, (BATCH, SEQ, C_IN), dtype=jnp.float32)
    params = make_params(k_p, C_IN, C_HIDDEN, NO_BLOCKS, NO_ANGLES)

    # --- f32 path: validates the kernel against the module semantics ---
    un32, nm32 = angle_resnet_forward(
        s, s_initial, params,
        no_blocks=NO_BLOCKS, no_angles=NO_ANGLES, eps=EPS,
        compute_dtype=jnp.float32)
    jax.block_until_ready((un32, nm32))

    un_ref, nm_ref = _reference_forward(
        s, s_initial, params,
        no_blocks=NO_BLOCKS, no_angles=NO_ANGLES, eps=EPS,
        compute_dtype=jnp.float32)

    assert un32.shape == (BATCH, SEQ, NO_ANGLES, 2)
    assert nm32.shape == (BATCH, SEQ, NO_ANGLES, 2)
    assert jnp.allclose(un32, un_ref, atol=1e-4, rtol=1e-4)
    assert jnp.allclose(nm32, nm_ref, atol=1e-4, rtol=1e-4)

    # --- bf16 fast path (default): compare against a bf16-mirroring reference ---
    un16, nm16 = angle_resnet_forward(
        s, s_initial, params,
        no_blocks=NO_BLOCKS, no_angles=NO_ANGLES, eps=EPS,
        compute_dtype=jnp.bfloat16)
    jax.block_until_ready((un16, nm16))

    un_ref16, nm_ref16 = _reference_forward(
        s, s_initial, params,
        no_blocks=NO_BLOCKS, no_angles=NO_ANGLES, eps=EPS,
        compute_dtype=jnp.bfloat16)

    assert un16.shape == (BATCH, SEQ, NO_ANGLES, 2)
    assert nm16.shape == (BATCH, SEQ, NO_ANGLES, 2)
    assert jnp.allclose(un16, un_ref16, atol=2e-2, rtol=2e-2)
    assert jnp.allclose(nm16, nm_ref16, atol=2e-2, rtol=2e-2)

    print("KERNEL_OK")
</pallas_src>

<mosaic_0001>
module attributes {stable_mosaic.version = 11 : i64} {
  func.func @_angle_resnet_kernel(%arg0: i32, %arg1: memref<8x96xf32, #tpu.memory_space<vmem>>, %arg2: memref<96x32xf32, #tpu.memory_space<vmem>>, %arg3: memref<1x32xf32, #tpu.memory_space<vmem>>, %arg4: memref<2x32x32xf32, #tpu.memory_space<vmem>>, %arg5: memref<2x1x32xf32, #tpu.memory_space<vmem>>, %arg6: memref<2x32x32xf32, #tpu.memory_space<vmem>>, %arg7: memref<2x1x32xf32, #tpu.memory_space<vmem>>, %arg8: memref<32x14xf32, #tpu.memory_space<vmem>>, %arg9: memref<1x14xf32, #tpu.memory_space<vmem>>, %arg10: memref<8x28xf32, #tpu.memory_space<vmem>>) attributes {dimension_semantics = [#tpu.dimension_semantics<parallel>], iteration_bounds = array<i64: 2>, scalar_prefetch = 0 : i64, scratch_operands = 0 : i64, tpu.core_type = #tpu.core_type<tc>, window_params = [{transform_indices = @transform_0, window_bounds = array<i64: 8, 96>}, {pipeline_mode = #tpu.pipeline_mode<synchronous>, transform_indices = @transform_1, window_bounds = array<i64: 96, 32>}, {pipeline_mode = #tpu.pipeline_mode<synchronous>, transform_indices = @transform_2, window_bounds = array<i64: 1, 32>}, {pipeline_mode = #tpu.pipeline_mode<synchronous>, transform_indices = @transform_3, window_bounds = array<i64: 2, 32, 32>}, {pipeline_mode = #tpu.pipeline_mode<synchronous>, transform_indices = @transform_4, window_bounds = array<i64: 2, 1, 32>}, {pipeline_mode = #tpu.pipeline_mode<synchronous>, transform_indices = @transform_5, window_bounds = array<i64: 2, 32, 32>}, {pipeline_mode = #tpu.pipeline_mode<synchronous>, transform_indices = @transform_6, window_bounds = array<i64: 2, 1, 32>}, {pipeline_mode = #tpu.pipeline_mode<synchronous>, transform_indices = @transform_7, window_bounds = array<i64: 32, 14>}, {pipeline_mode = #tpu.pipeline_mode<synchronous>, transform_indices = @transform_8, window_bounds = array<i64: 1, 14>}, {transform_indices = @transform_9, window_bounds = array<i64: 8, 28>}]} {
    %c0 = arith.constant 0 : index
    %c0_0 = arith.constant 0 : index
    %0 = vector.load %arg1[%c0, %c0_0] : memref<8x96xf32, #tpu.memory_space<vmem>>, vector<8x96xf32>
    %cst = arith.constant 0.000000e+00 : f32
    %1 = vector.broadcast %cst : f32 to vector<8x96xf32>
    %2 = arith.maximumf %0, %1 : vector<8x96xf32>
    %c0_1 = arith.constant 0 : index
    %c0_2 = arith.constant 0 : index
    %3 = vector.load %arg2[%c0_1, %c0_2] : memref<96x32xf32, #tpu.memory_space<vmem>>, vector<96x32xf32>
    %cst_3 = arith.constant dense<0.000000e+00> : vector<8x32xf32>
    %4 = tpu.matmul %2, %3, %cst_3 {dimension_numbers = #tpu.dot_dimension_numbers<[1], [0], [0], [1], [0, 0, 1, 1], [], []>} : vector<8x96xf32>, vector<96x32xf32>, vector<8x32xf32> -> vector<8x32xf32>
    %c0_4 = arith.constant 0 : index
    %c0_5 = arith.constant 0 : index
    %5 = vector.load %arg3[%c0_4, %c0_5] : memref<1x32xf32, #tpu.memory_space<vmem>>, vector<1x32xf32>
    %6 = vector.broadcast %5 : vector<1x32xf32> to vector<8x32xf32>
    %7 = arith.addf %4, %6 : vector<8x32xf32>
    %cst_6 = arith.constant 0.000000e+00 : f32
    %8 = vector.broadcast %cst_6 : f32 to vector<8x32xf32>
    %9 = arith.maximumf %7, %8 : vector<8x32xf32>
    %c0_7 = arith.constant 0 : index
    %c0_8 = arith.constant 0 : index
    %c0_9 = arith.constant 0 : index
    %10 = vector.load %arg4[%c0_7, %c0_8, %c0_9] : memref<2x32x32xf32, #tpu.memory_space<vmem>>, vector<1x32x32xf32>
    %11 = vector.shape_cast %10 : vector<1x32x32xf32> to vector<32x32xf32>
    %cst_10 = arith.constant dense<0.000000e+00> : vector<8x32xf32>
    %12 = tpu.matmul %9, %11, %cst_10 {dimension_numbers = #tpu.dot_dimension_numbers<[1], [0], [0], [1], [0, 0, 1, 1], [], []>} : vector<8x32xf32>, vector<32x32xf32>, vector<8x32xf32> -> vector<8x32xf32>
    %c0_11 = arith.constant 0 : index
    %c0_12 = arith.constant 0 : index
    %c0_13 = arith.constant 0 : index
    %13 = vector.load %arg5[%c0_11, %c0_12, %c0_13] : memref<2x1x32xf32, #tpu.memory_space<vmem>>, vector<1x1x32xf32>
    %14 = vector.shape_cast %13 : vector<1x1x32xf32> to vector<1x32xf32>
    %15 = vector.broadcast %14 : vector<1x32xf32> to vector<8x32xf32>
    %16 = arith.addf %12, %15 : vector<8x32xf32>
    %cst_14 = arith.constant 0.000000e+00 : f32
    %17 = vector.broadcast %cst_14 : f32 to vector<8x32xf32>
    %18 = arith.maximumf %16, %17 : vector<8x32xf32>
    %c0_15 = arith.constant 0 : index
    %c0_16 = arith.constant 0 : index
    %c0_17 = arith.constant 0 : index
    %19 = vector.load %arg6[%c0_15, %c0_16, %c0_17] : memref<2x32x32xf32, #tpu.memory_space<vmem>>, vector<1x32x32xf32>
    %20 = vector.shape_cast %19 : vector<1x32x32xf32> to vector<32x32xf32>
    %cst_18 = arith.constant dense<0.000000e+00> : vector<8x32xf32>
    %21 = tpu.matmul %18, %20, %cst_18 {dimension_numbers = #tpu.dot_dimension_numbers<[1], [0], [0], [1], [0, 0, 1, 1], [], []>} : vector<8x32xf32>, vector<32x32xf32>, vector<8x32xf32> -> vector<8x32xf32>
    %c0_19 = arith.constant 0 : index
    %c0_20 = arith.constant 0 : index
    %c0_21 = arith.constant 0 : index
    %22 = vector.load %arg7[%c0_19, %c0_20, %c0_21] : memref<2x1x32xf32, #tpu.memory_space<vmem>>, vector<1x1x32xf32>
    %23 = vector.shape_cast %22 : vector<1x1x32xf32> to vector<1x32xf32>
    %24 = vector.broadcast %23 : vector<1x32xf32> to vector<8x32xf32>
    %25 = arith.addf %21, %24 : vector<8x32xf32>
    %26 = arith.addf %7, %25 : vector<8x32xf32>
    %cst_22 = arith.constant 0.000000e+00 : f32
    %27 = vector.broadcast %cst_22 : f32 to vector<8x32xf32>
    %28 = arith.maximumf %26, %27 : vector<8x32xf32>
    %c1 = arith.constant 1 : index
    %c0_23 = arith.constant 0 : index
    %c0_24 = arith.constant 0 : index
    %29 = vector.load %arg4[%c1, %c0_23, %c0_24] : memref<2x32x32xf32, #tpu.memory_space<vmem>>, vector<1x32x32xf32>
    %30 = vector.shape_cast %29 : vector<1x32x32xf32> to vector<32x32xf32>
    %cst_25 = arith.constant dense<0.000000e+00> : vector<8x32xf32>
    %31 = tpu.matmul %28, %30, %cst_25 {dimension_numbers = #tpu.dot_dimension_numbers<[1], [0], [0], [1], [0, 0, 1, 1], [], []>} : vector<8x32xf32>, vector<32x32xf32>, vector<8x32xf32> -> vector<8x32xf32>
    %c1_26 = arith.constant 1 : index
    %c0_27 = arith.constant 0 : index
    %c0_28 = arith.constant 0 : index
    %32 = vector.load %arg5[%c1_26, %c0_27, %c0_28] : memref<2x1x32xf32, #tpu.memory_space<vmem>>, vector<1x1x32xf32>
    %33 = vector.shape_cast %32 : vector<1x1x32xf32> to vector<1x32xf32>
    %34 = vector.broadcast %33 : vector<1x32xf32> to vector<8x32xf32>
    %35 = arith.addf %31, %34 : vector<8x32xf32>
    %cst_29 = arith.constant 0.000000e+00 : f32
    %36 = vector.broadcast %cst_29 : f32 to vector<8x32xf32>
    %37 = arith.maximumf %35, %36 : vector<8x32xf32>
    %c1_30 = arith.constant 1 : index
    %c0_31 = arith.constant 0 : index
    %c0_32 = arith.constant 0 : index
    %38 = vector.load %arg6[%c1_30, %c0_31, %c0_32] : memref<2x32x32xf32, #tpu.memory_space<vmem>>, vector<1x32x32xf32>
    %39 = vector.shape_cast %38 : vector<1x32x32xf32> to vector<32x32xf32>
    %cst_33 = arith.constant dense<0.000000e+00> : vector<8x32xf32>
    %40 = tpu.matmul %37, %39, %cst_33 {dimension_numbers = #tpu.dot_dimension_numbers<[1], [0], [0], [1], [0, 0, 1, 1], [], []>} : vector<8x32xf32>, vector<32x32xf32>, vector<8x32xf32> -> vector<8x32xf32>
    %c1_34 = arith.constant 1 : index
    %c0_35 = arith.constant 0 : index
    %c0_36 = arith.constant 0 : index
    %41 = vector.load %arg7[%c1_34, %c0_35, %c0_36] : memref<2x1x32xf32, #tpu.memory_space<vmem>>, vector<1x1x32xf32>
    %42 = vector.shape_cast %41 : vector<1x1x32xf32> to vector<1x32xf32>
    %43 = vector.broadcast %42 : vector<1x32xf32> to vector<8x32xf32>
    %44 = arith.addf %40, %43 : vector<8x32xf32>
    %45 = arith.addf %26, %44 : vector<8x32xf32>
    %cst_37 = arith.constant 0.000000e+00 : f32
    %46 = vector.broadcast %cst_37 : f32 to vector<8x32xf32>
    %47 = arith.maximumf %45, %46 : vector<8x32xf32>
    %c0_38 = arith.constant 0 : index
    %c0_39 = arith.constant 0 : index
    %48 = vector.load %arg8[%c0_38, %c0_39] : memref<32x14xf32, #tpu.memory_space<vmem>>, vector<32x14xf32>
    %cst_40 = arith.constant dense<0.000000e+00> : vector<8x14xf32>
    %49 = tpu.matmul %47, %48, %cst_40 {dimension_numbers = #tpu.dot_dimension_numbers<[1], [0], [0], [1], [0, 0, 1, 1], [], []>} : vector<8x32xf32>, vector<32x14xf32>, vector<8x14xf32> -> vector<8x14xf32>
    %c0_41 = arith.constant 0 : index
    %c0_42 = arith.constant 0 : index
    %50 = vector.load %arg9[%c0_41, %c0_42] : memref<1x14xf32, #tpu.memory_space<vmem>>, vector<1x14xf32>
    %51 = vector.broadcast %50 : vector<1x14xf32> to vector<8x14xf32>
    %52 = arith.addf %49, %51 : vector<8x14xf32>
    %53 = vector.extract_strided_slice %52 {offsets = [0, 0], sizes = [8, 7], strides = [1, 1]} : vector<8x14xf32> to vector<8x7xf32>
    %54 = vector.extract_strided_slice %52 {offsets = [0, 7], sizes = [8, 7], strides = [1, 1]} : vector<8x14xf32> to vector<8x7xf32>
    %55 = arith.mulf %53, %53 : vector<8x7xf32>
    %56 = arith.mulf %54, %54 : vector<8x7xf32>
    %57 = arith.addf %55, %56 : vector<8x7xf32>
    %cst_43 = arith.constant 9.99999996E-13 : f32
    %58 = vector.broadcast %cst_43 : f32 to vector<8x7xf32>
    %59 = arith.maximumf %57, %58 : vector<8x7xf32>
    %60 = math.rsqrt %59 : vector<8x7xf32>
    %61 = arith.mulf %53, %60 : vector<8x7xf32>
    %62 = arith.mulf %54, %60 : vector<8x7xf32>
    %63 = tpu.concatenate %52, %61, %62 in 1 : vector<8x14xf32>, vector<8x7xf32>, vector<8x7xf32> -> vector<8x28xf32>
    %c0_44 = arith.constant 0 : index
    %c0_45 = arith.constant 0 : index
    %64 = vector.load %arg10[%c0_44, %c0_45] : memref<8x28xf32, #tpu.memory_space<vmem>>, vector<8x28xf32>
    tpu.vector_store %arg10[%c0_44, %c0_45], %63 {strides = array<i32>} : memref<8x28xf32, #tpu.memory_space<vmem>>, vector<8x28xf32>,
    return
  }
  func.func @transform_0(%arg0: i32) -> (i32, i32) {
    %c0_i32 = arith.constant 0 : i32
    %c0_i32_0 = arith.constant 0 : i32
    return %arg0, %c0_i32 : i32, i32
  }
  func.func @transform_1(%arg0: i32) -> (i32, i32) {
    %c0_i32 = arith.constant 0 : i32
    %c0_i32_0 = arith.constant 0 : i32
    %c0_i32_1 = arith.constant 0 : i32
    return %c0_i32, %c0_i32_0 : i32, i32
  }
  func.func @transform_2(%arg0: i32) -> (i32, i32) {
    %c0_i32 = arith.constant 0 : i32
    %c0_i32_0 = arith.constant 0 : i32
    %c0_i32_1 = arith.constant 0 : i32
    return %c0_i32, %c0_i32_0 : i32, i32
  }
  func.func @transform_3(%arg0: i32) -> (i32, i32, i32) {
    %c0_i32 = arith.constant 0 : i32
    %c0_i32_0 = arith.constant 0 : i32
    %c0_i32_1 = arith.constant 0 : i32
    %c0_i32_2 = arith.constant 0 : i32
    return %c0_i32, %c0_i32_0, %c0_i32_1 : i32, i32, i32
  }
  func.func @transform_4(%arg0: i32) -> (i32, i32, i32) {
    %c0_i32 = arith.constant 0 : i32
    %c0_i32_0 = arith.constant 0 : i32
    %c0_i32_1 = arith.constant 0 : i32
    %c0_i32_2 = arith.constant 0 : i32
    return %c0_i32, %c0_i32_0, %c0_i32_1 : i32, i32, i32
  }
  func.func @transform_5(%arg0: i32) -> (i32, i32, i32) {
    %c0_i32 = arith.constant 0 : i32
    %c0_i32_0 = arith.constant 0 : i32
    %c0_i32_1 = arith.constant 0 : i32
    %c0_i32_2 = arith.constant 0 : i32
    return %c0_i32, %c0_i32_0, %c0_i32_1 : i32, i32, i32
  }
  func.func @transform_6(%arg0: i32) -> (i32, i32, i32) {
    %c0_i32 = arith.constant 0 : i32
    %c0_i32_0 = arith.constant 0 : i32
    %c0_i32_1 = arith.constant 0 : i32
    %c0_i32_2 = arith.constant 0 : i32
    return %c0_i32, %c0_i32_0, %c0_i32_1 : i32, i32, i32
  }
  func.func @transform_7(%arg0: i32) -> (i32, i32) {
    %c0_i32 = arith.constant 0 : i32
    %c0_i32_0 = arith.constant 0 : i32
    %c0_i32_1 = arith.constant 0 : i32
    return %c0_i32, %c0_i32_0 : i32, i32
  }
  func.func @transform_8(%arg0: i32) -> (i32, i32) {
    %c0_i32 = arith.constant 0 : i32
    %c0_i32_0 = arith.constant 0 : i32
    %c0_i32_1 = arith.constant 0 : i32
    return %c0_i32, %c0_i32_0 : i32, i32
  }
  func.func @transform_9(%arg0: i32) -> (i32, i32) {
    %c0_i32 = arith.constant 0 : i32
    %c0_i32_0 = arith.constant 0 : i32
    return %arg0, %c0_i32 : i32, i32
  }
}

</mosaic_0001>

<bundles_post_ra>
// kernel: tpu_custom_call.1
= control target key start
LH: loop header
LB: loop body
LE: loop exit
PB: predicated region body
PF: predicated region fallthrough
CT: control target
= control target key end

     0   :  { %14 = vsyncpa [#allocation3], 0  ;;  %s1528_s0 = inlined_call_operand.vmem [shape: f32[16,96], index: 0, kind: input, shape index: {}]   ;;  %s1529_s1 = inlined_call_operand.vmem [shape: f32[96,32], index: 1, kind: input, shape index: {}]   ;;  %s1530_s2 = inlined_call_operand.vmem [shape: f32[1,32], index: 2, kind: input, shape index: {}]   ;;  %s1531_s3 = inlined_call_operand.vmem [shape: f32[2,32,32], index: 3, kind: input, shape index: {}]   ;;  %s1532_s4 = inlined_call_operand.vmem [shape: f32[2,1,32], index: 4, kind: input, shape index: {}]   ;;  %s1533_s5 = inlined_call_operand.vmem [shape: f32[2,32,32], index: 5, kind: input, shape index: {}]   ;;  %s1534_s6 = inlined_call_operand.vmem [shape: f32[2,1,32], index: 6, kind: input, shape index: {}]   ;;  %s1535_s7 = inlined_call_operand.vmem [shape: f32[32,14], index: 7, kind: input, shape index: {}]   ;;  %s1536_s8 = inlined_call_operand.vmem [shape: f32[1,14], index: 8, kind: input, shape index: {}]   ;;  %s1537_s9 = inlined_call_operand.hbm [shape: f32[16,28], index: 9, kind: output, shape index: {}]  }
   0x1   :  { %16 = vsyncpa [#allocation3 + $0x1], 0  ;;  %s1272_s30 = smov 0   ;;  %s1274_s10 = smov 0  }
   0x2   :  { %s1276_s11 = smov 0   ;;  %s1278_s12 = smov 0  }
   0x3 LB: > { %s1293_s13 = sadd.s32 4294967295, %s1214_s12   ;;  %s956_s14 = sadd.s32 4294967294, %s1214_s12   ;;  %s1214_s12 = sphi %s1278_s12, %s1543_s12   ;;  %s1210_s11 = sphi %s1276_s11, %s1542_s11   ;;  %s1206_s10 = sphi %s1274_s10, %s1541_s10   ;;  %s1202_s30 = sphi %s1272_s30, %s1540_s30  }
   0x4   : > { %s1297_s15 = sadd.s32 1, %s1214_s12   ;;  %s223_s16 = sadd.s32 1, %s1210_s11 }
   0x5   : > { %s220_s17 = ssub.s32 %s1214_s12, %s1297_s15  ;;  %p233_p0 = scmp.ne.s32.totalorder %s1210_s11, %s1206_s10 }
   0x6   : > { %p221_p1 = scmp.eq.s32.totalorder %s220_s17, 0  ;;  %p234_p2 = scmp.eq.s32.totalorder %s1293_s13, 1 }
   0x7   : > { %p239_p3 = scmp.ne.s32.totalorder %s1206_s10, %s1202_s30  ;;  %p240_p4 = scmp.eq.s32.totalorder %s956_s14, 1 }
   0x8   : > { %s1308_s18 = scalar_select %p221_p1, %s1210_s11, %s223_s16  }
   0x9   : > { %p1310_p5 = por %p234_p2, %p233_p0  ;;  %p1314_p6 = por %p240_p4, %p239_p3 }
   0xa   : > { %p959_p7 = scmp.ge.s32.totalorder %s1214_s12, 1  ;;  %p289_p8 = scmp.lt.s32.totalorder %s1214_s12, 3 }
   0xc   : > { %p290_p9 = pnand %p959_p7, %p289_p8 }
   0xd   : > { %p324_p10 = scmp.lt.s32.totalorder (!%p290_p9), %s1293_s13, 1  ;;  %s1218_s14 = smov (!%p290_p9), 121  }
   0xe   : > { %293 = sbr.rel (%p290_p9) target bundleno = 1609 (0x649), region = 56  ;;  %s1219_s16 = smov (!%p290_p9), 7  }
   0xf   : > { %s1220_s17 = smov (!%p290_p9), 14   ;;  %s985_s23 = sshll.u32 (!%p290_p9), %s1293_s13, 7 }
  0x10   : > { %s1493_s28 = scalar_lea.hbm (!%p290_p9), %s1537_s9, %s985_s23 }
  0x13   : > { %v341_v0 = vld [vmem:[%s1529_s1 + $0x58] sm:$0xff]  ;;  %v1216_v1 = vmov 0.0   ;;  %v340_v2 = vld [vmem:[%s1529_s1 + $0x50] sm:$0xff]  ;;  %vm1217_vm0 = vmmov 0   ;;  %v339_v3 = vld [vmem:[%s1529_s1 + $0x48] sm:$0xff]  ;;  %s325_s21 = scalar_select %p324_p10, %s1293_s13, 1 }
  0x14   : > { %1026 = vmatprep.subr.mxu0 %v1216_v1  ;;  %1050 = vmatprep.mubr.msk.f32.mxu0 %vm1217_vm0, %v1216_v1  ;;  %v427_v4 = vld [vmem:[%s1531_s3 + $0x18] sm:$0xff]  ;;  %v338_v5 = vld [vmem:[%s1529_s1 + $0x40] sm:$0xff]  ;;  %v336_v7 = vld [vmem:[%s1529_s1 + $0x30] sm:$0xff]  ;;  %vm349_vm1 = vcmask 785408   ;;  %vm435_vm2 = vcmask 261120   ;;  %vm877_vm3 = vcmask 113664  }
  0x15   : > { %1027 = vmatpush3.msra.mxu0 %v341_v0  ;;  %1053 = vmatprep.subr.mxu1 %v1216_v1  ;;  %v337_v6 = vld [vmem:[%s1529_s1 + $0x38] sm:$0xff]  ;;  %v335_v8 = vld [vmem:[%s1529_s1 + $0x28] sm:$0xff]  ;;  %s961_s26 = sshll.u32 %s325_s21, 3  ;;  %v334_v9 = vld [vmem:[%s1529_s1 + $0x20] sm:$0xff]  ;;  %vm879_vm4 = vcmask 171008   ;;  %vm881_vm5 = vcmask 228352  }
  0x16   : > { %1028 = vmatprep.subr.mxu0 %v1216_v1  ;;  %1061 = vmatprep.mubr.msk.f32.mxu1 %vm1217_vm0, %v1216_v1  ;;  %v333_v10 = vld [vmem:[%s1529_s1 + $0x18] sm:$0xff]  ;;  %s327_s22 = scalar_lea.vmem %s1528_s0, %s961_s26  ;;  %v332_v11 = vld [vmem:[%s1529_s1 + $0x10] sm:$0xff]  ;;  %v331_v13 = vld [vmem:[%s1529_s1 + $0x8] sm:$0xff]  ;;  %s1221_s13 = smov [#allocation2]  }
  0x17   : > { %1029 = vmatpush3.msra.mxu0 %v340_v2  ;;  %1054 = vmatpush3.msra.mxu1 %v427_v4  ;;  %v328_v12 = vld [vmem:[%s327_s22] sm:$0xff]  ;;  %v426_v16 = vld [vmem:[%s1531_s3 + $0x10] sm:$0xff]  ;;  %v425_v17 = vld [vmem:[%s1531_s3 + $0x8] sm:$0xff]  ;;  %s321_s22 = sand.u32 1, %s1206_s10  }
  0x18   : > { %1030 = vmatprep.subr.mxu0 %v1216_v1  ;;  %1055 = vmatprep.subr.mxu1 %v1216_v1  ;;  %v330_v14 = vld [vmem:[%s1529_s1] sm:$0xff]  ;;  %v329_v15 = vmax.f32 %v328_v12, 0.0  ;;  %v513_v24 = vld [vmem:[%s1533_s5 + $0x18] sm:$0xff]  ;;  %v512_v25 = vld [vmem:[%s1533_s5 + $0x10] sm:$0xff]  ;;  %s960_s21 = sshll.u32 %s321_s22, 3  ;;  %s884_s29 = scalar_lea.sflag [#allocation3], %s321_s22 }
  0x19   : > { %1031 = vmatpush3.msra.mxu0 %v339_v3  ;;  %1056 = vmatpush3.msra.mxu1 %v426_v16  ;;  %v424_v18 = vld [vmem:[%s1531_s3] sm:$0xff]  ;;  %v511_v26 = vld [vmem:[%s1533_s5 + $0x8] sm:$0xff]  ;;  %v971_v33 = vld [vmem:[%s1531_s3 + $0x38] sm:$0xff]  ;;  %s323_s24 = scalar_lea.vmem [#allocation2], %s960_s21 }
  0x1a   : > { %1032 = vmatprep.subr.mxu0 %v1216_v1  ;;  %1057 = vmatprep.subr.mxu1 %v1216_v1  ;;  %v962_v19 = vld [vmem:[%s1530_s2] ss:$0 sm:$0xff]  ;;  %v970_v34 = vld [vmem:[%s1531_s3 + $0x30] sm:$0xff]  ;;  %v969_v35 = vld [vmem:[%s1531_s3 + $0x28] sm:$0xff]  ;;  %s897_s25 = sshll.u32 %s323_s24, 4  ;;  %s898_s25 = int_to_ptr.vmem [resolvable:$true] %s897_s25 }
  0x1b   : > { %1033 = vmatpush3.msra.mxu0 %v338_v5  ;;  %1058 = vmatpush3.msra.mxu1 %v425_v17  ;;  %v510_v27 = vld [vmem:[%s1533_s5] sm:$0xff]  ;;  %v978_v37 = vld [vmem:[%s1533_s5 + $0x38] sm:$0xff]  ;;  %v977_v44 = vld [vmem:[%s1533_s5 + $0x30] sm:$0xff] }
  0x1c   : > { %1034 = vmatprep.subr.mxu0 %v1216_v1  ;;  %1059 = vmatprep.subr.mxu1 %v1216_v1  ;;  %v964_v28 = vld [vmem:[%s1532_s4] ss:$0 sm:$0xff]  ;;  %v976_v45 = vld [vmem:[%s1533_s5 + $0x28] sm:$0xff]  ;;  %v973_v47 = vld [vmem:[%s1532_s4 + $0x1] ss:$0 sm:$0xff] }
  0x1d   : > { %1035 = vmatpush3.msra.mxu0 %v337_v6  ;;  %1060 = vmatpush3.msra.mxu1 %v424_v18  ;;  %v968_v36 = vld [vmem:[%s1531_s3 + $0x20] sm:$0xff]  ;;  %v774_v52 = vld [vmem:[%s1535_s7 + $0x18] sm:$0xff]  ;;  %v773_v53 = vld [vmem:[%s1535_s7 + $0x10] sm:$0xff] }
  0x1e   : > { %1036 = vmatprep.subr.mxu0 %v1216_v1  ;;  %1064 = vmatprep.subr.mxu1 %v1216_v1  ;;  %v966_v38 = vld [vmem:[%s1534_s6] ss:$0 sm:$0xff]  ;;  %v772_v54 = vld [vmem:[%s1535_s7 + $0x8] sm:$0xff]  ;;  %v980_v56 = vld [vmem:[%s1534_s6 + $0x1] ss:$0 sm:$0xff] }
  0x1f   : > { %1037 = vmatpush3.msra.mxu0 %v336_v7  ;;  %v975_v46 = vld [vmem:[%s1533_s5 + $0x20] sm:$0xff] }
  0x20   : > { %1038 = vmatprep.subr.mxu0 %v1216_v1  ;;  %v771_v55 = vld [vmem:[%s1535_s7] sm:$0xff] }
  0x21   : > { %1039 = vmatpush3.msra.mxu0 %v335_v8  ;;  %v982_v62 = vld [vmem:[%s1536_s8] ss:$0 sm:$0xff] }
  0x22   : > { %1040 = vmatprep.subr.mxu0 %v1216_v1 }
  0x23   : > { %1041 = vmatpush3.msra.mxu0 %v334_v9 }
  0x24   : > { %1042 = vmatprep.subr.mxu0 %v1216_v1 }
  0x25   : > { %1043 = vmatpush3.msra.mxu0 %v333_v10 }
  0x26   : > { %1044 = vmatprep.subr.mxu0 %v1216_v1 }
  0x27   : > { %1045 = vmatpush3.msra.mxu0 %v332_v11 }
  0x28   : > { %1046 = vmatprep.subr.mxu0 %v1216_v1 }
  0x29   : > { %1047 = vmatpush3.msra.mxu0 %v331_v13 }
  0x2a   : > { %1048 = vmatprep.subr.mxu0 %v1216_v1 }
  0x2b   : > { %1049 = vmatpush3.msra.mxu0 %v330_v14 }
  0x2c   : > { %1051 = vmatmul.mubr.msk.f32.vlgmr.msra.gmra.mxu0 %vm349_vm1, %v329_v15  ;;  %1086 = vmatprep.subr.mxu0 %v1216_v1 }
  0x2d   : > { %1094 = vmatprep.mubr.msk.f32.mxu0 %vm1217_vm0, %v1216_v1  ;;  %1087 = vmatpush3.msra.mxu0 %v978_v37 }
  0x2e   : > { %1088 = vmatprep.subr.mxu0 %v1216_v1 }
  0x2f   : > { %1089 = vmatpush3.msra.mxu0 %v977_v44 }
  0x30   : > { %1090 = vmatprep.subr.mxu0 %v1216_v1 }
  0x31   : > { %1091 = vmatpush3.msra.mxu0 %v976_v45 }
  0x32   : > { %1092 = vmatprep.subr.mxu0 %v1216_v1 }
  0x33   : > { %1093 = vmatpush3.msra.mxu0 %v975_v46 }
  0xec   : > { %v419_v20 = vpop.f32.mrf.mxu0 }
  0xed   : > { %v420_v21 = vadd.f32 %v962_v19, %v419_v20 }
  0xee   : > { %v1052_v22 = vpop.f32.mrf.mxu0 }
  0xef   : > { %v423_v23 = vmax.f32 %v420_v21, 0.0 }
  0xf1   : > { %1062 = vmatmul.mubr.msk.f32.vlgmr.msra.gmra.mxu1 %vm435_vm2, %v423_v23 }
  0xf2   : > { %1065 = vmatpush3.msra.mxu1 %v513_v24  ;;  %1072 = vmatprep.mubr.msk.f32.mxu1 %vm1217_vm0, %v1216_v1 }
  0xf3   : > { %1066 = vmatprep.subr.mxu1 %v1216_v1 }
  0xf4   : > { %1067 = vmatpush3.msra.mxu1 %v512_v25 }
  0xf5   : > { %1068 = vmatprep.subr.mxu1 %v1216_v1 }
  0xf6   : > { %1069 = vmatpush3.msra.mxu1 %v511_v26 }
  0xf7   : > { %1070 = vmatprep.subr.mxu1 %v1216_v1 }
  0xf8   : > { %1071 = vmatpush3.msra.mxu1 %v510_v27 }
  0xf9   : > { %1075 = vmatprep.subr.mxu1 %v1216_v1 }
 0x1b1   : > { %v505_v29 = vpop.f32.mrf.mxu1 }
 0x1b2   : > { %v506_v30 = vadd.f32 %v964_v28, %v505_v29 }
 0x1b3   : > { %v1063_v31 = vpop.f32.mrf.mxu1 }
 0x1b4   : > { %v509_v32 = vmax.f32 %v506_v30, 0.0 }
 0x1b6   : > { %1073 = vmatmul.mubr.msk.f32.vlgmr.msra.gmra.mxu1 %vm435_vm2, %v509_v32 }
 0x1b7   : > { %1083 = vmatprep.mubr.msk.f32.mxu1 %vm1217_vm0, %v1216_v1  ;;  %1076 = vmatpush3.msra.mxu1 %v971_v33 }
 0x1b8   : > { %1077 = vmatprep.subr.mxu1 %v1216_v1 }
 0x1b9   : > { %1078 = vmatpush3.msra.mxu1 %v970_v34 }
 0x1ba   : > { %1079 = vmatprep.subr.mxu1 %v1216_v1 }
 0x1bb   : > { %1080 = vmatpush3.msra.mxu1 %v969_v35 }
 0x1bc   : > { %1081 = vmatprep.subr.mxu1 %v1216_v1 }
 0x1bd   : > { %1082 = vmatpush3.msra.mxu1 %v968_v36 }
 0x1be   : > { %1097 = vmatprep.subr.mxu1 %v1216_v1 }
 0x276   : > { %v590_v39 = vpop.f32.mrf.mxu1 }
 0x277   : > { %v591_v40 = vadd.f32 %v966_v38, %v590_v39 }
 0x278   : > { %v1074_v41 = vpop.f32.mrf.mxu1 }
 0x279   : > { %v594_v42 = vadd.f32 %v591_v40, %v420_v21 }
 0x27b   : > { %v595_v43 = vmax.f32 %v594_v42, 0.0 }
 0x27d   : > { %1084 = vmatmul.mubr.msk.f32.vlgmr.msra.gmra.mxu1 %vm435_vm2, %v595_v43 }
 0x27e   : > { %1105 = vmatprep.mubr.msk.f32.mxu1 %vm1217_vm0, %v1216_v1  ;;  %1098 = vmatpush3.msra.mxu1 %v774_v52 }
 0x27f   : > { %1099 = vmatprep.subr.mxu1 %v1216_v1 }
 0x280   : > { %1100 = vmatpush3.msra.mxu1 %v773_v53 }
 0x281   : > { %1101 = vmatprep.subr.mxu1 %v1216_v1 }
 0x282   : > { %1102 = vmatpush3.msra.mxu1 %v772_v54 }
 0x283   : > { %1103 = vmatprep.subr.mxu1 %v1216_v1 }
 0x284   : > { %1104 = vmatpush3.msra.mxu1 %v771_v55 }
 0x33d   : > { %v678_v48 = vpop.f32.mrf.mxu1 }
 0x33e   : > { %v679_v49 = vadd.f32 %v973_v47, %v678_v48 }
 0x33f   : > { %v1085_v50 = vpop.f32.mrf.mxu1 }
 0x340   : > { %v682_v51 = vmax.f32 %v679_v49, 0.0 }
 0x342   : > { %1095 = vmatmul.mubr.msk.f32.vlgmr.msra.gmra.mxu0 %vm435_vm2, %v682_v51 }
 0x402   : > { %v765_v57 = vpop.f32.mrf.mxu0 }
 0x403   : > { %v766_v58 = vadd.f32 %v980_v56, %v765_v57 }
 0x404   : > { %v1096_v59 = vpop.f32.mrf.mxu0 }
 0x405   : > { %v769_v60 = vadd.f32 %v766_v58, %v594_v42 }
 0x407   : > { %v770_v61 = vmax.f32 %v769_v60, 0.0 }
 0x409   : > { %1106 = vmatmul.mubr.msk.f32.vlgmr.msra.gmra.mxu1 %vm435_vm2, %v770_v61 }
 0x4c9   : > { %v851_v63 = vpop.f32.mrf.mxu1 }
 0x4ca   : > { %v852_v0 = vadd.f32 %v982_v62, %v851_v63 }
 0x4cb   : > { %v1107_v1 = vpop.f32.mrf.mxu1 }
 0x4cc   : > { %v855_v2 = vmul.f32 %v852_v0, %v852_v0 }
 0x4ce   : > { %857 = vrot.lane.b32.xlu0 %v855_v2, %s1218_s14  ;;  %s1154_s14 = scalar_lea.vmem %s898_s25, 128 }
 0x4cf   : > { %p1155_p11 = scmp.ne.s32.totalorder %s898_s25, %s1154_s14 }
 0x4d1   : > { %p1156_p12 = pnand %p1155_p11, %p1310_p5 }
 0x4d3   : > { %p1157_p13 = pneg %p1156_p12 }
 0x540   : > { %v858_v3 = vpop.permute.xlu0 %857 }
 0x541   : > { %v860_v4 = vadd.f32 %v858_v3, %v855_v2 }
 0x543   : > { %v861_v5 = vmax.f32 %v860_v4, 1e-12 }
 0x545   : > { %1152 = vrsqrt.f32 %v861_v5 }
 0x552   : > { %v1153_v6 = vpop.eup %1152 }
 0x553   : > { %865 = vrot.lane.b32.xlu0 %v1153_v6, %s1219_s16  ;;  %v863_v7 = vmul.f32 %v1153_v6, %v852_v0  ;;  %s1158_s16 = sshll.u32 %s1221_s13, 4  ;;  %s1159_s16 = int_to_ptr.vmem [resolvable:$false] %s1158_s16 }
 0x554   : > { %p1161_p0 = scmp.lt.s32.totalorder %s898_s25, %s1159_s16 }
 0x555   : > { %870 = vrot.lane.b32.xlu1 %v863_v7, %s1220_s17 }
 0x5c5   : > { %v866_v8 = vpop.permute.xlu0 %865 }
 0x5c6   : > { %v868_v9 = vmul.f32 %v866_v8, %v852_v0 }
 0x5c7   : > { %v871_v10 = vpop.permute.xlu1 %870 }
 0x5c8   : > { %874 = vrot.lane.b32.xlu1 %v868_v9, %s1220_s17  ;;  %v878_v11 = vsel %vm877_vm3, %v852_v0, %v871_v10  ;;  %s1160_s17 = scalar_lea.vmem %s1159_s16, 256 }
 0x5c9   : > { %p1162_p1 = scmp.lt.s32.totalorder %s1160_s17, %s1154_s14 }
 0x5cb   : > { %p1163_p2 = por %p1162_p1, %p1161_p0 }
 0x5cd   : > { %p1164_p3 = pnand %p1163_p2, %p1157_p13 }
 0x63a   : > { %v875_v12 = vpop.permute.xlu1 %874 }
 0x63b   : > { %v880_v13 = vsel %vm879_vm4, %v878_v11, %v875_v12 }
 0x63c   : > { %882 = vst.msk [vmem:[%s323_s24] sm:$0xff] %vm881_vm5, %v880_v13 }
 0x63d   : > { %1167 = shalt.err (!%p1164_p3)
}
 0x63e   : > { %s1168_s21 = scalar_lea.hbm %s1493_s28, 128  ;;  %s1172_s24 = scalar_lea.hbm %s1537_s9, 256 }
 0x63f   : > { %p1169_p4 = scmp.ne.s32.totalorder %s1493_s28, %s1168_s21  ;;  %p1173_p9 = scmp.lt.s32.totalorder %s1493_s28, %s1537_s9 }
 0x640   : > { %p1174_p10 = scmp.lt.s32.totalorder %s1172_s24, %s1168_s21 }
 0x641   : > { %p1170_p7 = pnand %p1169_p4, %p1310_p5 }
 0x642   : > { %p1175_p11 = por %p1174_p10, %p1173_p9 }
 0x643   : > { %p1171_p8 = pneg %p1170_p7 }
 0x645   : > { %p1176_p12 = pnand %p1175_p11, %p1171_p8 }
 0x647   : > { %1179 = shalt.err (!%p1176_p12)
}
 0x648   : > { %1108 = dma.vmem_to_hbm [thread:$0]  (%p1310_p5), %s898_s25, 128, %s1493_s28, %s884_s29  }
 0x649 PF: > { %p1114_p13 = scmp.ge.s32.totalorder %s1214_s12, 2  ;;  %s909_s14 = sand.u32 1, %s1202_s30  }
 0x64a   : > { %s910_s13 = scalar_lea.sflag [#allocation3], %s909_s14 }
 0x64b   : > { %p1111_p0 = pnand %p1114_p13, %p1314_p6 }
 0x64d   : > { %p1112_p1 = pneg %p1111_p0 }
 0x64f   : > { %1197 = dma.done.wait (%p1112_p1), %s910_s13, 128  }
 0x650   : > { %1199 = vsyncadd (%p1112_p1), %s910_s13, 4294967168  ;;  %p19_p2 = scmp.ge.s32.totalorder %s1297_s15, 4   ;;  %s1540_s30 = smov %s1206_s10 }
 0x651   : > { %s1541_s10 = smov %s1210_s11  ;;  %s1542_s11 = smov %s1308_s18 }
 0x652   : > { %s1543_s12 = smov %s1297_s15  ;;  %21 = sbr.rel (!%p19_p2) target bundleno = 3 (0x3), region = 95 }
 0x657   :  { %915 = vsyncpa [#allocation3], 1 }
 0x658   :  { %917 = vsyncpa [#allocation3 + $0x1], 1 }

</bundles_post_ra>
